<compile_context>
chip_gen: v5e
topology: v5e:2x2
jax: 0.10.0
libtpu: 0.0.40
codegen_flags: <defaults>
</compile_context>

<pallas_src>
import jax
import jax.numpy as jnp
from jax.experimental import pallas as pl
from jax.experimental.pallas import tpu as pltpu

C_IN = 2          # conv1 input channels
C_MID = 3         # conv1 output / conv2 input channels
H_IN = 64         # input spatial size
HO = 32           # spatial size after the stride-2 1x1 conv on 64x64 input
R, L = 8, 128     # lane-dense vreg layout of one 32x32 f32 plane
SUB = 0.989


def _rot(v, d, axis):
    """out[..., i, ...] = v[..., (i + d) % n, ...]  (static d)."""
    n = v.shape[axis]
    return pltpu.roll(v, (-d) % n, axis=axis)


def _fused_conv_kernel(xs_ref, const_ref, w_ref, out_ref):
    # xs_ref   : VMEM (C_IN, 8, 128) -- subsampled input, one lane-dense plane/channel
    # const_ref: VMEM (8, 128)       -- precomputed (b2 - 0.989 + bias-through-conv2) plane
    # w_ref    : SMEM (18,)          -- fused 3x3 taps, flat index ci*9 + kh*3 + kw
    # out_ref  : VMEM (8, 128)

    row = jax.lax.broadcasted_iota(jnp.int32, (R, L), 0)
    col = jax.lax.broadcasted_iota(jnp.int32, (R, L), 1)
    jmod = col % HO                                        # spatial column j
    # spatial row  i = 4*row + col // 32
    top = jnp.logical_and(row == 0, col < HO)              # i == 0
    bot = jnp.logical_and(row == R - 1, col >= L - HO)     # i == HO - 1
    left = jmod == 0                                       # j == 0
    right = jmod == HO - 1                                 # j == HO - 1

    def row_shift(v, dh):
        # value at spatial (i+dh, j); zero where i+dh is out of range
        if dh == 0:
            return v
        lane = _rot(v, HO * dh, axis=1)    # flat shift by 32*dh within a sublane row
        both = _rot(lane, dh, axis=0)      # ... plus sublane carry for wrapping lanes
        if dh == 1:
            out = jnp.where(col < L - HO, lane, both)
            return jnp.where(bot, 0.0, out)
        out = jnp.where(col >= HO, lane, both)
        return jnp.where(top, 0.0, out)

    def col_shift(v, dw):
        # value at spatial (i, j+dw); zero where j+dw is out of range
        if dw == 0:
            return v
        rolled = _rot(v, dw, axis=1)
        edge = right if dw == 1 else left
        return jnp.where(edge, 0.0, rolled)

    # accumulator is seeded by the precomputed constant plane
    acc = const_ref[...]

    # data part: fused 2-in/1-out 3x3 conv = 18 shifted FMAs (XLU rolls + VPU FMAs)
    for ci in range(C_IN):
        x = xs_ref[ci]
        for kh in range(3):
            xr = row_shift(x, kh - 1)
            for kw in range(3):
                acc = acc + w_ref[ci * 9 + kh * 3 + kw] * col_shift(xr, kw - 1)

    # ReLU, single dense (8,128) store
    out_ref[...] = jnp.maximum(acc, 0.0)


@jax.jit
def model_forward(x1, w1, b1, w2, b2):
    # x1: (1, 2, 64, 64), w1: (3, 2, 1, 1), b1: (3,), w2: (1, 3, 3, 3), b2: (1,)
    # The lane-dense layout and the roll/mask index math below are hard-wired
    # to this shape -- guard it explicitly.
    assert x1.shape == (1, C_IN, H_IN, H_IN), x1.shape
    assert w1.shape == (C_MID, C_IN, 1, 1) and w2.shape == (1, C_MID, 3, 3)

    # the stride-2 1x1 conv only sees every other pixel -> subsample, lane-dense
    xs = x1[0, :, ::2, ::2].reshape(C_IN, R, L)

    # exact algebraic fusion of conv1 (1x1) into conv2 (3x3), done host-side
    w2k = w2[0]                                                      # (C_MID, 3, 3)
    w_eff = jnp.einsum("khw,kc->chw", w2k, w1[:, :, 0, 0]).reshape(C_IN * 9)
    wb = jnp.einsum("k,khw->hw", b1, w2k)                            # (3, 3)

    # constant plane: (b2 - 0.989) + conv1 bias pushed through conv2's
    # zero-padded window (position dependent at the border)
    valid = jnp.pad(jnp.ones((HO, HO), jnp.float32), 1)              # (34, 34)
    const = jnp.full((HO, HO), b2[0] - SUB, dtype=jnp.float32)
    for kh in range(3):
        for kw in range(3):
            const = const + wb[kh, kw] * valid[kh:kh + HO, kw:kw + HO]
    const = const.reshape(R, L)

    out = pl.pallas_call(
        _fused_conv_kernel,
        out_shape=jax.ShapeDtypeStruct((R, L), jnp.float32),
        in_specs=[
            pl.BlockSpec(memory_space=pltpu.MemorySpace.VMEM),       # xs planes
            pl.BlockSpec(memory_space=pltpu.MemorySpace.VMEM),       # constant plane
            pl.BlockSpec(memory_space=pltpu.MemorySpace.SMEM),       # flat fused taps
        ],
        out_specs=pl.BlockSpec(memory_space=pltpu.MemorySpace.VMEM),
    )(xs, const, w_eff)
    # TODO(synk): for real workloads batch B images per pallas_call with a
    # grid over batch and dimension_semantics=("parallel",) so v7x's two
    # TensorCores split the work; batch=1 here so a single grid point is used.
    return out.reshape(1, 1, HO, HO)


def _reference(x1, w1, b1, w2, b2):
    # pure-JAX reference for sanity checking
    v1 = jax.lax.conv_general_dilated(
        x1, w1, window_strides=(2, 2), padding="VALID",
        dimension_numbers=("NCHW", "OIHW", "NCHW")) + b1.reshape(1, C_MID, 1, 1)
    v2 = jax.lax.conv_general_dilated(
        v1, w2, window_strides=(1, 1), padding=((1, 1), (1, 1)),
        dimension_numbers=("NCHW", "OIHW", "NCHW")) + b2.reshape(1, 1, 1, 1)
    return jnp.maximum(v2 - SUB, 0.0)


if __name__ == "__main__":
    key = jax.random.PRNGKey(0)
    kx, k1, kb1, k2, kb2 = jax.random.split(key, 5)

    x1 = jax.random.normal(kx, (1, 2, 64, 64), dtype=jnp.float32)

    # deterministic parameter init (shapes from the nn.Module __init__, OIHW)
    w1 = 0.1 * jax.random.normal(k1, (C_MID, C_IN, 1, 1), dtype=jnp.float32)   # 1x1 conv
    b1 = 0.1 * jax.random.normal(kb1, (C_MID,), dtype=jnp.float32)
    w2 = 0.1 * jax.random.normal(k2, (1, C_MID, 3, 3), dtype=jnp.float32)      # 3x3 conv
    b2 = 0.1 * jax.random.normal(kb2, (1,), dtype=jnp.float32)

    out = model_forward(x1, w1, b1, w2, b2)
    out = jax.block_until_ready(out)

    ref = _reference(x1, w1, b1, w2, b2)
    assert out.shape == (1, 1, HO, HO), out.shape
    assert jnp.allclose(out, ref, atol=1e-5, rtol=1e-5), float(jnp.max(jnp.abs(out - ref)))

    print("KERNEL_OK")
</pallas_src>

<mosaic_0001>
module attributes {stable_mosaic.version = 11 : i64} {
  func.func @_fused_conv_kernel(%arg0: memref<2x8x128xf32, #tpu.memory_space<vmem>>, %arg1: memref<8x128xf32, #tpu.memory_space<vmem>>, %arg2: memref<18xf32, #tpu.memory_space<smem>>, %arg3: memref<8x128xf32, #tpu.memory_space<vmem>>) attributes {dimension_semantics = [], scalar_prefetch = 0 : i64, scratch_operands = 0 : i64, tpu.core_type = #tpu.core_type<tc>} {
    %0 = tpu.iota {dimensions = array<i32: 0>} : vector<8x128xi32>
    %1 = tpu.iota {dimensions = array<i32: 1>} : vector<8x128xi32>
    %c32_i32 = arith.constant 32 : i32
    %c0_i32 = arith.constant 0 : i32
    %2 = arith.cmpi eq, %c32_i32, %c0_i32 : i32
    %c1_i32 = arith.constant 1 : i32
    %3 = arith.select %2, %c1_i32, %c32_i32 : i32
    %4 = vector.broadcast %3 : i32 to vector<8x128xi32>
    %5 = arith.remsi %1, %4 : vector<8x128xi32>
    %c0_i32_0 = arith.constant 0 : i32
    %6 = vector.broadcast %c0_i32_0 : i32 to vector<8x128xi32>
    %7 = arith.cmpi ne, %5, %6 : vector<8x128xi32>
    %c0_i32_1 = arith.constant 0 : i32
    %8 = vector.broadcast %c0_i32_1 : i32 to vector<8x128xi32>
    %9 = arith.cmpi slt, %5, %8 : vector<8x128xi32>
    %c0_i32_2 = arith.constant 0 : i32
    %10 = arith.cmpi slt, %3, %c0_i32_2 : i32
    %11 = vector.broadcast %10 : i1 to vector<8x128xi1>
    %12 = vector.broadcast %11 : vector<8x128xi1> to vector<8x128xi1>
    %13 = arith.xori %9, %12 : vector<8x128xi1>
    %14 = arith.andi %13, %7 : vector<8x128xi1>
    %15 = vector.broadcast %3 : i32 to vector<8x128xi32>
    %16 = arith.addi %5, %15 : vector<8x128xi32>
    %17 = arith.select %14, %16, %5 : vector<8x128xi1>, vector<8x128xi32>
    %c0_i32_3 = arith.constant 0 : i32
    %18 = vector.broadcast %c0_i32_3 : i32 to vector<8x128xi32>
    %19 = arith.cmpi eq, %0, %18 : vector<8x128xi32>
    %c32_i32_4 = arith.constant 32 : i32
    %20 = vector.broadcast %c32_i32_4 : i32 to vector<8x128xi32>
    %21 = arith.cmpi slt, %1, %20 : vector<8x128xi32>
    %22 = arith.andi %19, %21 : vector<8x128xi1>
    %c7_i32 = arith.constant 7 : i32
    %23 = vector.broadcast %c7_i32 : i32 to vector<8x128xi32>
    %24 = arith.cmpi eq, %0, %23 : vector<8x128xi32>
    %c96_i32 = arith.constant 96 : i32
    %25 = vector.broadcast %c96_i32 : i32 to vector<8x128xi32>
    %26 = arith.cmpi sge, %1, %25 : vector<8x128xi32>
    %27 = arith.andi %24, %26 : vector<8x128xi1>
    %c0_i32_5 = arith.constant 0 : i32
    %28 = vector.broadcast %c0_i32_5 : i32 to vector<8x128xi32>
    %29 = arith.cmpi eq, %17, %28 : vector<8x128xi32>
    %c31_i32 = arith.constant 31 : i32
    %30 = vector.broadcast %c31_i32 : i32 to vector<8x128xi32>
    %31 = arith.cmpi eq, %17, %30 : vector<8x128xi32>
    %c0 = arith.constant 0 : index
    %c0_6 = arith.constant 0 : index
    %32 = vector.load %arg1[%c0, %c0_6] : memref<8x128xf32, #tpu.memory_space<vmem>>, vector<8x128xf32>
    %c0_7 = arith.constant 0 : index
    %c0_8 = arith.constant 0 : index
    %c0_9 = arith.constant 0 : index
    %33 = vector.load %arg0[%c0_7, %c0_8, %c0_9] : memref<2x8x128xf32, #tpu.memory_space<vmem>>, vector<1x8x128xf32>
    %34 = vector.shape_cast %33 : vector<1x8x128xf32> to vector<8x128xf32>
    %c32_i32_10 = arith.constant 32 : i32
    %35 = tpu.dynamic_rotate %34 by %c32_i32_10 dim 1 : vector<8x128xf32>, i32 -> vector<8x128xf32>
    %c1_i32_11 = arith.constant 1 : i32
    %36 = tpu.dynamic_rotate %35 by %c1_i32_11 dim 0 : vector<8x128xf32>, i32 -> vector<8x128xf32>
    %c32_i32_12 = arith.constant 32 : i32
    %37 = vector.broadcast %c32_i32_12 : i32 to vector<8x128xi32>
    %38 = arith.cmpi sge, %1, %37 : vector<8x128xi32>
    %39 = arith.select %38, %35, %36 : vector<8x128xi1>, vector<8x128xf32>
    %cst = arith.constant 0.000000e+00 : f32
    %40 = vector.broadcast %cst : f32 to vector<8x128xf32>
    %41 = arith.select %22, %40, %39 : vector<8x128xi1>, vector<8x128xf32>
    %c0_13 = arith.constant 0 : index
    %42 = memref.load %arg2[%c0_13] : memref<18xf32, #tpu.memory_space<smem>>
    %c1_i32_14 = arith.constant 1 : i32
    %43 = tpu.dynamic_rotate %41 by %c1_i32_14 dim 1 : vector<8x128xf32>, i32 -> vector<8x128xf32>
    %cst_15 = arith.constant 0.000000e+00 : f32
    %44 = vector.broadcast %cst_15 : f32 to vector<8x128xf32>
    %45 = arith.select %29, %44, %43 : vector<8x128xi1>, vector<8x128xf32>
    %46 = vector.broadcast %42 : f32 to vector<8x128xf32>
    %47 = arith.mulf %46, %45 : vector<8x128xf32>
    %48 = arith.addf %32, %47 : vector<8x128xf32>
    %c1 = arith.constant 1 : index
    %49 = memref.load %arg2[%c1] : memref<18xf32, #tpu.memory_space<smem>>
    %50 = vector.broadcast %49 : f32 to vector<8x128xf32>
    %51 = arith.mulf %50, %41 : vector<8x128xf32>
    %52 = arith.addf %48, %51 : vector<8x128xf32>
    %c2 = arith.constant 2 : index
    %53 = memref.load %arg2[%c2] : memref<18xf32, #tpu.memory_space<smem>>
    %c127_i32 = arith.constant 127 : i32
    %54 = tpu.dynamic_rotate %41 by %c127_i32 dim 1 : vector<8x128xf32>, i32 -> vector<8x128xf32>
    %cst_16 = arith.constant 0.000000e+00 : f32
    %55 = vector.broadcast %cst_16 : f32 to vector<8x128xf32>
    %56 = arith.select %31, %55, %54 : vector<8x128xi1>, vector<8x128xf32>
    %57 = vector.broadcast %53 : f32 to vector<8x128xf32>
    %58 = arith.mulf %57, %56 : vector<8x128xf32>
    %59 = arith.addf %52, %58 : vector<8x128xf32>
    %c3 = arith.constant 3 : index
    %60 = memref.load %arg2[%c3] : memref<18xf32, #tpu.memory_space<smem>>
    %c1_i32_17 = arith.constant 1 : i32
    %61 = tpu.dynamic_rotate %34 by %c1_i32_17 dim 1 : vector<8x128xf32>, i32 -> vector<8x128xf32>
    %cst_18 = arith.constant 0.000000e+00 : f32
    %62 = vector.broadcast %cst_18 : f32 to vector<8x128xf32>
    %63 = arith.select %29, %62, %61 : vector<8x128xi1>, vector<8x128xf32>
    %64 = vector.broadcast %60 : f32 to vector<8x128xf32>
    %65 = arith.mulf %64, %63 : vector<8x128xf32>
    %66 = arith.addf %59, %65 : vector<8x128xf32>
    %c4 = arith.constant 4 : index
    %67 = memref.load %arg2[%c4] : memref<18xf32, #tpu.memory_space<smem>>
    %68 = vector.broadcast %67 : f32 to vector<8x128xf32>
    %69 = arith.mulf %68, %34 : vector<8x128xf32>
    %70 = arith.addf %66, %69 : vector<8x128xf32>
    %c5 = arith.constant 5 : index
    %71 = memref.load %arg2[%c5] : memref<18xf32, #tpu.memory_space<smem>>
    %c127_i32_19 = arith.constant 127 : i32
    %72 = tpu.dynamic_rotate %34 by %c127_i32_19 dim 1 : vector<8x128xf32>, i32 -> vector<8x128xf32>
    %cst_20 = arith.constant 0.000000e+00 : f32
    %73 = vector.broadcast %cst_20 : f32 to vector<8x128xf32>
    %74 = arith.select %31, %73, %72 : vector<8x128xi1>, vector<8x128xf32>
    %75 = vector.broadcast %71 : f32 to vector<8x128xf32>
    %76 = arith.mulf %75, %74 : vector<8x128xf32>
    %77 = arith.addf %70, %76 : vector<8x128xf32>
    %c96_i32_21 = arith.constant 96 : i32
    %78 = tpu.dynamic_rotate %34 by %c96_i32_21 dim 1 : vector<8x128xf32>, i32 -> vector<8x128xf32>
    %c7_i32_22 = arith.constant 7 : i32
    %79 = tpu.dynamic_rotate %78 by %c7_i32_22 dim 0 : vector<8x128xf32>, i32 -> vector<8x128xf32>
    %c96_i32_23 = arith.constant 96 : i32
    %80 = vector.broadcast %c96_i32_23 : i32 to vector<8x128xi32>
    %81 = arith.cmpi slt, %1, %80 : vector<8x128xi32>
    %82 = arith.select %81, %78, %79 : vector<8x128xi1>, vector<8x128xf32>
    %cst_24 = arith.constant 0.000000e+00 : f32
    %83 = vector.broadcast %cst_24 : f32 to vector<8x128xf32>
    %84 = arith.select %27, %83, %82 : vector<8x128xi1>, vector<8x128xf32>
    %c6 = arith.constant 6 : index
    %85 = memref.load %arg2[%c6] : memref<18xf32, #tpu.memory_space<smem>>
    %c1_i32_25 = arith.constant 1 : i32
    %86 = tpu.dynamic_rotate %84 by %c1_i32_25 dim 1 : vector<8x128xf32>, i32 -> vector<8x128xf32>
    %cst_26 = arith.constant 0.000000e+00 : f32
    %87 = vector.broadcast %cst_26 : f32 to vector<8x128xf32>
    %88 = arith.select %29, %87, %86 : vector<8x128xi1>, vector<8x128xf32>
    %89 = vector.broadcast %85 : f32 to vector<8x128xf32>
    %90 = arith.mulf %89, %88 : vector<8x128xf32>
    %91 = arith.addf %77, %90 : vector<8x128xf32>
    %c7 = arith.constant 7 : index
    %92 = memref.load %arg2[%c7] : memref<18xf32, #tpu.memory_space<smem>>
    %93 = vector.broadcast %92 : f32 to vector<8x128xf32>
    %94 = arith.mulf %93, %84 : vector<8x128xf32>
    %95 = arith.addf %91, %94 : vector<8x128xf32>
    %c8 = arith.constant 8 : index
    %96 = memref.load %arg2[%c8] : memref<18xf32, #tpu.memory_space<smem>>
    %c127_i32_27 = arith.constant 127 : i32
    %97 = tpu.dynamic_rotate %84 by %c127_i32_27 dim 1 : vector<8x128xf32>, i32 -> vector<8x128xf32>
    %cst_28 = arith.constant 0.000000e+00 : f32
    %98 = vector.broadcast %cst_28 : f32 to vector<8x128xf32>
    %99 = arith.select %31, %98, %97 : vector<8x128xi1>, vector<8x128xf32>
    %100 = vector.broadcast %96 : f32 to vector<8x128xf32>
    %101 = arith.mulf %100, %99 : vector<8x128xf32>
    %102 = arith.addf %95, %101 : vector<8x128xf32>
    %c1_29 = arith.constant 1 : index
    %c0_30 = arith.constant 0 : index
    %c0_31 = arith.constant 0 : index
    %103 = vector.load %arg0[%c1_29, %c0_30, %c0_31] : memref<2x8x128xf32, #tpu.memory_space<vmem>>, vector<1x8x128xf32>
    %104 = vector.shape_cast %103 : vector<1x8x128xf32> to vector<8x128xf32>
    %c32_i32_32 = arith.constant 32 : i32
    %105 = tpu.dynamic_rotate %104 by %c32_i32_32 dim 1 : vector<8x128xf32>, i32 -> vector<8x128xf32>
    %c1_i32_33 = arith.constant 1 : i32
    %106 = tpu.dynamic_rotate %105 by %c1_i32_33 dim 0 : vector<8x128xf32>, i32 -> vector<8x128xf32>
    %c32_i32_34 = arith.constant 32 : i32
    %107 = vector.broadcast %c32_i32_34 : i32 to vector<8x128xi32>
    %108 = arith.cmpi sge, %1, %107 : vector<8x128xi32>
    %109 = arith.select %108, %105, %106 : vector<8x128xi1>, vector<8x128xf32>
    %cst_35 = arith.constant 0.000000e+00 : f32
    %110 = vector.broadcast %cst_35 : f32 to vector<8x128xf32>
    %111 = arith.select %22, %110, %109 : vector<8x128xi1>, vector<8x128xf32>
    %c9 = arith.constant 9 : index
    %112 = memref.load %arg2[%c9] : memref<18xf32, #tpu.memory_space<smem>>
    %c1_i32_36 = arith.constant 1 : i32
    %113 = tpu.dynamic_rotate %111 by %c1_i32_36 dim 1 : vector<8x128xf32>, i32 -> vector<8x128xf32>
    %cst_37 = arith.constant 0.000000e+00 : f32
    %114 = vector.broadcast %cst_37 : f32 to vector<8x128xf32>
    %115 = arith.select %29, %114, %113 : vector<8x128xi1>, vector<8x128xf32>
    %116 = vector.broadcast %112 : f32 to vector<8x128xf32>
    %117 = arith.mulf %116, %115 : vector<8x128xf32>
    %118 = arith.addf %102, %117 : vector<8x128xf32>
    %c10 = arith.constant 10 : index
    %119 = memref.load %arg2[%c10] : memref<18xf32, #tpu.memory_space<smem>>
    %120 = vector.broadcast %119 : f32 to vector<8x128xf32>
    %121 = arith.mulf %120, %111 : vector<8x128xf32>
    %122 = arith.addf %118, %121 : vector<8x128xf32>
    %c11 = arith.constant 11 : index
    %123 = memref.load %arg2[%c11] : memref<18xf32, #tpu.memory_space<smem>>
    %c127_i32_38 = arith.constant 127 : i32
    %124 = tpu.dynamic_rotate %111 by %c127_i32_38 dim 1 : vector<8x128xf32>, i32 -> vector<8x128xf32>
    %cst_39 = arith.constant 0.000000e+00 : f32
    %125 = vector.broadcast %cst_39 : f32 to vector<8x128xf32>
    %126 = arith.select %31, %125, %124 : vector<8x128xi1>, vector<8x128xf32>
    %127 = vector.broadcast %123 : f32 to vector<8x128xf32>
    %128 = arith.mulf %127, %126 : vector<8x128xf32>
    %129 = arith.addf %122, %128 : vector<8x128xf32>
    %c12 = arith.constant 12 : index
    %130 = memref.load %arg2[%c12] : memref<18xf32, #tpu.memory_space<smem>>
    %c1_i32_40 = arith.constant 1 : i32
    %131 = tpu.dynamic_rotate %104 by %c1_i32_40 dim 1 : vector<8x128xf32>, i32 -> vector<8x128xf32>
    %cst_41 = arith.constant 0.000000e+00 : f32
    %132 = vector.broadcast %cst_41 : f32 to vector<8x128xf32>
    %133 = arith.select %29, %132, %131 : vector<8x128xi1>, vector<8x128xf32>
    %134 = vector.broadcast %130 : f32 to vector<8x128xf32>
    %135 = arith.mulf %134, %133 : vector<8x128xf32>
    %136 = arith.addf %129, %135 : vector<8x128xf32>
    %c13 = arith.constant 13 : index
    %137 = memref.load %arg2[%c13] : memref<18xf32, #tpu.memory_space<smem>>
    %138 = vector.broadcast %137 : f32 to vector<8x128xf32>
    %139 = arith.mulf %138, %104 : vector<8x128xf32>
    %140 = arith.addf %136, %139 : vector<8x128xf32>
    %c14 = arith.constant 14 : index
    %141 = memref.load %arg2[%c14] : memref<18xf32, #tpu.memory_space<smem>>
    %c127_i32_42 = arith.constant 127 : i32
    %142 = tpu.dynamic_rotate %104 by %c127_i32_42 dim 1 : vector<8x128xf32>, i32 -> vector<8x128xf32>
    %cst_43 = arith.constant 0.000000e+00 : f32
    %143 = vector.broadcast %cst_43 : f32 to vector<8x128xf32>
    %144 = arith.select %31, %143, %142 : vector<8x128xi1>, vector<8x128xf32>
    %145 = vector.broadcast %141 : f32 to vector<8x128xf32>
    %146 = arith.mulf %145, %144 : vector<8x128xf32>
    %147 = arith.addf %140, %146 : vector<8x128xf32>
    %c96_i32_44 = arith.constant 96 : i32
    %148 = tpu.dynamic_rotate %104 by %c96_i32_44 dim 1 : vector<8x128xf32>, i32 -> vector<8x128xf32>
    %c7_i32_45 = arith.constant 7 : i32
    %149 = tpu.dynamic_rotate %148 by %c7_i32_45 dim 0 : vector<8x128xf32>, i32 -> vector<8x128xf32>
    %c96_i32_46 = arith.constant 96 : i32
    %150 = vector.broadcast %c96_i32_46 : i32 to vector<8x128xi32>
    %151 = arith.cmpi slt, %1, %150 : vector<8x128xi32>
    %152 = arith.select %151, %148, %149 : vector<8x128xi1>, vector<8x128xf32>
    %cst_47 = arith.constant 0.000000e+00 : f32
    %153 = vector.broadcast %cst_47 : f32 to vector<8x128xf32>
    %154 = arith.select %27, %153, %152 : vector<8x128xi1>, vector<8x128xf32>
    %c15 = arith.constant 15 : index
    %155 = memref.load %arg2[%c15] : memref<18xf32, #tpu.memory_space<smem>>
    %c1_i32_48 = arith.constant 1 : i32
    %156 = tpu.dynamic_rotate %154 by %c1_i32_48 dim 1 : vector<8x128xf32>, i32 -> vector<8x128xf32>
    %cst_49 = arith.constant 0.000000e+00 : f32
    %157 = vector.broadcast %cst_49 : f32 to vector<8x128xf32>
    %158 = arith.select %29, %157, %156 : vector<8x128xi1>, vector<8x128xf32>
    %159 = vector.broadcast %155 : f32 to vector<8x128xf32>
    %160 = arith.mulf %159, %158 : vector<8x128xf32>
    %161 = arith.addf %147, %160 : vector<8x128xf32>
    %c16 = arith.constant 16 : index
    %162 = memref.load %arg2[%c16] : memref<18xf32, #tpu.memory_space<smem>>
    %163 = vector.broadcast %162 : f32 to vector<8x128xf32>
    %164 = arith.mulf %163, %154 : vector<8x128xf32>
    %165 = arith.addf %161, %164 : vector<8x128xf32>
    %c17 = arith.constant 17 : index
    %166 = memref.load %arg2[%c17] : memref<18xf32, #tpu.memory_space<smem>>
    %c127_i32_50 = arith.constant 127 : i32
    %167 = tpu.dynamic_rotate %154 by %c127_i32_50 dim 1 : vector<8x128xf32>, i32 -> vector<8x128xf32>
    %cst_51 = arith.constant 0.000000e+00 : f32
    %168 = vector.broadcast %cst_51 : f32 to vector<8x128xf32>
    %169 = arith.select %31, %168, %167 : vector<8x128xi1>, vector<8x128xf32>
    %170 = vector.broadcast %166 : f32 to vector<8x128xf32>
    %171 = arith.mulf %170, %169 : vector<8x128xf32>
    %172 = arith.addf %165, %171 : vector<8x128xf32>
    %cst_52 = arith.constant 0.000000e+00 : f32
    %173 = vector.broadcast %cst_52 : f32 to vector<8x128xf32>
    %174 = arith.maximumf %172, %173 : vector<8x128xf32>
    %c0_53 = arith.constant 0 : index
    %c0_54 = arith.constant 0 : index
    %175 = vector.load %arg3[%c0_53, %c0_54] : memref<8x128xf32, #tpu.memory_space<vmem>>, vector<8x128xf32>
    tpu.vector_store %arg3[%c0_53, %c0_54], %174 {strides = array<i32>} : memref<8x128xf32, #tpu.memory_space<vmem>>, vector<8x128xf32>,
    return
  }
}

</mosaic_0001>

<bundles_post_ra>
// kernel: squeeze.13
= control target key start
LH: loop header
LB: loop body
LE: loop exit
PB: predicated region body
PF: predicated region fallthrough
CT: control target
= control target key end

     0   :  { %s63_s10 = smov 96   ;;  %s64_s11 = smov 64   ;;  %vm3_vm0 = vcmask 261120   ;;  %vm14_vm1 = vcmask 1048320   ;;  %vm27_vm2 = vcmask 785920   ;;  %vm40_vm3 = vcmask 523520   ;;  %s124_s0 = inlined_call_operand.vmem [shape: f32[1,2,32,32], index: 0, kind: input, shape index: {}]   ;;  %s125_s1 = inlined_call_operand.vmem [shape: f32[2,8,128], index: 1, kind: output, shape index: {}]  }
   0x1   :  { %v51_v0 = vld [vmem:[%s124_s0 + $0x3] ss:$4 sm:$0xff]   ;;  %v54_v1 = vld [vmem:[%s124_s0 + $0x2] ss:$4 sm:$0xff]   ;;  %v57_v2 = vld [vmem:[%s124_s0 + $0x1] ss:$4 sm:$0xff]  }
   0x2   :  { %12 = vrot.lane.b32.xlu0 %v51_v0, %s63_s10  ;;  %25 = vrot.lane.b32.xlu1 %v54_v1, %s64_s11  ;;  %s65_s14 = smov 32   ;;  %v52_v3 = vld [vmem:[%s124_s0 + $0x23] ss:$4 sm:$0xff]   ;;  %v55_v4 = vld [vmem:[%s124_s0 + $0x22] ss:$4 sm:$0xff]  }
   0x3   :  { %38 = vrot.lane.b32.xlu2 %v57_v2, %s65_s14  ;;  %v58_v5 = vld [vmem:[%s124_s0 + $0x21] ss:$4 sm:$0xff]   ;;  %v2_v6 = vld [vmem:[%s124_s0] ss:$4 sm:$0xff]  }
   0x4   :  { %4 = vst.msk [vmem:[%s125_s1] sm:$0xff] %vm3_vm0, %v2_v6   ;;  %v49_v7 = vld [vmem:[%s124_s0 + $0x20] ss:$4 sm:$0xff]  }
   0x5   :  { %50 = vst.msk [vmem:[%s125_s1 + $0x8] sm:$0xff] %vm3_vm0, %v49_v7  }
   0xa   :  { %18 = vrot.lane.b32.xlu0 %v52_v3, %s63_s10  ;;  %31 = vrot.lane.b32.xlu1 %v55_v4, %s64_s11 }
   0xb   :  { %44 = vrot.lane.b32.xlu2 %v58_v5, %s65_s14 }
  0x5d   :  { %v39_v8 = vpop.permute.xlu2 %38  }
  0x65   :  { %v45_v9 = vpop.permute.xlu2 %44  }
  0x74   :  { %v13_v10 = vpop.permute.xlu0 %12   ;;  %v26_v11 = vpop.permute.xlu1 %25  }
  0x75   :  { %15 = vst.msk [vmem:[%s125_s1] sm:$0xff] %vm14_vm1, %v13_v10  }
  0x76   :  { %28 = vst.msk [vmem:[%s125_s1] sm:$0xff] %vm27_vm2, %v26_v11  }
  0x77   :  { %41 = vst.msk [vmem:[%s125_s1] sm:$0xff] %vm40_vm3, %v39_v8  }
  0x7c   :  { %v19_v12 = vpop.permute.xlu0 %18   ;;  %v32_v13 = vpop.permute.xlu1 %31  }
  0x7d   :  { %53 = vst.msk [vmem:[%s125_s1 + $0x8] sm:$0xff] %vm14_vm1, %v19_v12  }
  0x7e   :  { %56 = vst.msk [vmem:[%s125_s1 + $0x8] sm:$0xff] %vm27_vm2, %v32_v13  }
  0x7f   :  { %59 = vst.msk [vmem:[%s125_s1 + $0x8] sm:$0xff] %vm40_vm3, %v45_v9  }

// kernel: model_forward.1
= control target key start
LH: loop header
LB: loop body
LE: loop exit
PB: predicated region body
PF: predicated region fallthrough
CT: control target
= control target key end

     0   :  { %8 = vsyncpa [#allocation3], 0  ;;  %s229_s15 = smov [#allocation2]   ;;  %s340_s0 = inlined_call_operand.vmem [shape: f32[2,8,128], index: 0, kind: input, shape index: {}]   ;;  %s341_s1 = inlined_call_operand.vmem [shape: f32[8,128], index: 1, kind: input, shape index: {}]   ;;  %s342_s2 = inlined_call_operand.vmem [shape: f32[18], index: 2, kind: input, shape index: {}]   ;;  %s343_s3 = inlined_call_operand.vmem [shape: f32[8,128], index: 3, kind: output, shape index: {}]  }
   0x1   :  { %s18_s14 = sshll.u32 %s342_s2, 4  ;;  %s19_s14 = int_to_ptr.vmem [resolvable:$true] %s18_s14 }
   0x2   :  { %21 = dma.vmem_to_smem %s19_s14, 16, %s229_s15, [#allocation3]  }
   0x3   :  { %227 = dma.done.wait [#allocation3], 16  }
   0x4   :  { %228 = vsyncadd [#allocation3], 4294967280 }
   0x5   :  { %26 = sfence }
   0x6   :  { %v260_v0 = vld [vmem:[%s340_s0] sm:$0xff]  ;;  %v265_v1 = vld [vmem:[%s340_s0 + $0x8] sm:$0xff]  ;;  %s230_s20 = smov 32   ;;  %s231_s2 = smov 96   ;;  %v27_v2 = vlaneseq }
   0x7   :  { %53 = vrot.lane.b32.xlu0 %v260_v0, %s230_s20  ;;  %121 = vrot.lane.b32.xlu1 %v265_v1, %s230_s20  ;;  %s232_s21 = smov 1   ;;  %s233_s22 = smov 127   ;;  %v51_v26 = vld [vmem:[%s341_s1] sm:$0xff] }
   0x8   :  { %v30_v3 = vand.u32 127, %v27_v2  ;;  %v28_v4 = vshrl.u32 %v27_v2, 7  ;;  %s59_s0 = sld [smem:[#allocation2]] }
   0x9   :  { %s192_s23 = sld [smem:[#allocation2 + $0x1]] }
   0xa   :  { %vm43_vm0 = vcmp.eq.s32.totalorder %v28_v4, 0  ;;  %vm44_vm1 = vcmp.lt.s32.totalorder %v30_v3, 32  ;;  %vm56_vm2 = vcmp.ge.s32.totalorder %v30_v3, 32  ;;  %vm46_vm4 = vcmp.eq.s32.totalorder %v28_v4, 7  ;;  %s193_s24 = sld [smem:[#allocation2 + $0x2]] }
   0xb   :  { %vm45_vm3 = vmand %vm43_vm0, %vm44_vm1  ;;  %vm47_vm5 = vcmp.ge.s32.totalorder %v30_v3, 96  ;;  %vm98_vm6 = vcmp.lt.s32.totalorder %v30_v3, 96  ;;  %v35_v21 = vand.u32 31, %v30_v3  ;;  %s194_s25 = sld [smem:[#allocation2 + $0x3]] }
   0xc   :  { %vm48_vm7 = vmand %vm46_vm4, %vm47_vm5  ;;  %s195_s28 = sld [smem:[#allocation2 + $0x4]] }
   0xd   :  { %vm295_vm8 = vcmp.eq.s32.totalorder %v35_v21, 0  ;;  %s196_s29 = sld [smem:[#allocation2 + $0x5]]  ;;  %vm304_vm9 = vcmp.eq.s32.totalorder %v35_v21, 31 }
   0xe   :  { %v63_v23 = vstv %s59_s0  ;;  %s197_s1 = sld [smem:[#allocation2 + $0x6]] }
   0xf   :  { %95 = vrot.lane.b32.xlu0 %v260_v0, %s231_s2  ;;  %162 = vrot.lane.b32.xlu1 %v265_v1, %s231_s2  ;;  %v67_v25 = vstv %s192_s23  ;;  %s198_s30 = sld [smem:[#allocation2 + $0x7]] }
  0x10   :  { %v74_v34 = vstv %s193_s24  ;;  %s199_s4 = sld [smem:[#allocation2 + $0x8]] }
  0x11   :  { %v81_v35 = vstv %s194_s25  ;;  %s201_s5 = sld [smem:[#allocation2 + $0x9]] }
  0x12   :  { %v85_v40 = vstv %s195_s28  ;;  %s202_s6 = sld [smem:[#allocation2 + $0xa]] }
  0x13   :  { %v92_v43 = vstv %s196_s29  ;;  %v86_v46 = vmul.f32 %v85_v40, %v260_v0  ;;  %s203_s7 = sld [smem:[#allocation2 + $0xb]] }
  0x14   :  { %v105_v49 = vstv %s197_s1  ;;  %s317_s8 = sld [smem:[#allocation2 + $0xc]] }
  0x15   :  { %v109_v52 = vstv %s198_s30  ;;  %s205_s9 = sld [smem:[#allocation2 + $0xd]] }
  0x16   :  { %v116_v60 = vstv %s199_s4  ;;  %s206_s10 = sld [smem:[#allocation2 + $0xe]] }
  0x17   :  { %78 = vrot.lane.b32.xlu0 %v260_v0, %s232_s21  ;;  %89 = vrot.lane.b32.xlu1 %v260_v0, %s233_s22  ;;  %v130_v0 = vstv %s201_s5  ;;  %s207_s11 = sld [smem:[#allocation2 + $0xf]] }
  0x18   :  { %v134_v4 = vstv %s202_s6  ;;  %s208_s12 = sld [smem:[#allocation2 + $0x10]] }
  0x19   :  { %s209_s13 = sld [smem:[#allocation2 + $0x11]] }
  0x79   :  { %v54_v5 = vpop.permute.xlu0 %53  ;;  %v122_v6 = vpop.permute.xlu1 %121 }
  0x7a   :  { %v55_v7 = vrot.slane %v54_v5, 7  ;;  %v123_v8 = vrot.slane %v122_v6, 7 }
  0x7c   :  { %v57_v9 = vsel %vm56_vm2, %v54_v5, %v55_v7  ;;  %v124_v10 = vsel %vm56_vm2, %v122_v6, %v123_v8  ;;  %v141_v7 = vstv %s203_s7 }
  0x7d   :  { %v58_v11 = vsel %vm45_vm3, 0.0, %v57_v9  ;;  %v275_v12 = vsel %vm45_vm3, 0.0, %v124_v10 }
  0x7e   :  { %60 = vrot.lane.b32.xlu2 %v58_v11, %s232_s21  ;;  %127 = vrot.lane.b32.xlu1 %v275_v12, %s232_s21  ;;  %v68_v29 = vmul.f32 %v67_v25, %v58_v11  ;;  %v135_v9 = vmul.f32 %v134_v4, %v275_v12 }
  0x81   :  { %v96_v13 = vpop.permute.xlu0 %95  ;;  %v163_v17 = vpop.permute.xlu1 %162 }
  0x82   :  { %v97_v14 = vrot.slane %v96_v13, 1  ;;  %v164_v18 = vrot.slane %v163_v17, 1 }
  0x84   :  { %v99_v15 = vsel %vm98_vm6, %v96_v13, %v97_v14  ;;  %v165_v19 = vsel %vm98_vm6, %v163_v17, %v164_v18  ;;  %v148_v13 = vstv %s317_s8  ;;  %v152_v14 = vstv %s205_s9 }
  0x85   :  { %v100_v16 = vsel %vm48_vm7, 0.0, %v99_v15  ;;  %v287_v20 = vsel %vm48_vm7, 0.0, %v165_v19  ;;  %v159_v19 = vstv %s206_s10 }
  0x86   :  { %113 = vrot.lane.b32.xlu0 %v100_v16, %s233_s22  ;;  %71 = vrot.lane.b32.xlu2 %v58_v11, %s233_s22  ;;  %v110_v56 = vmul.f32 %v109_v52, %v100_v16 }
  0x87   :  { %156 = vrot.lane.b32.xlu1 %v265_v1, %s233_s22 }
  0x89   :  { %v79_v31 = vpop.permute.xlu0 %78  ;;  %v90_v38 = vpop.permute.xlu1 %89 }
  0x8a   :  { %v80_v36 = vsel %vm295_vm8, 0.0, %v79_v31  ;;  %v91_v44 = vsel %vm304_vm9, 0.0, %v90_v38  ;;  %v175_v31 = vstv %s208_s12 }
  0x8b   :  { %v82_v42 = vmul.f32 %v81_v35, %v80_v36  ;;  %v93_v48 = vmul.f32 %v92_v43, %v91_v44  ;;  %v182_v36 = vstv %s209_s13  ;;  %v176_v38 = vmul.f32 %v175_v31, %v287_v20 }
  0x8e   :  { %145 = vrot.lane.b32.xlu0 %v265_v1, %s232_s21  ;;  %102 = vrot.lane.b32.xlu2 %v100_v16, %s232_s21 }
  0x96   :  { %179 = vrot.lane.b32.xlu0 %v287_v20, %s233_s22  ;;  %138 = vrot.lane.b32.xlu2 %v275_v12, %s233_s22  ;;  %v153_v12 = vmul.f32 %v265_v1, %v152_v14 }
  0x9e   :  { %168 = vrot.lane.b32.xlu2 %v287_v20, %s232_s21 }
  0xd8   :  { %v61_v24 = vpop.permute.xlu2 %60 }
  0xd9   :  { %v62_v27 = vsel %vm295_vm8, 0.0, %v61_v24 }
  0xda   :  { %v64_v28 = vmul.f32 %v63_v23, %v62_v27 }
  0xdc   :  { %v65_v30 = vadd.f32 %v64_v28, %v51_v26  ;;  %v171_v28 = vstv %s207_s11 }
  0xde   :  { %v69_v33 = vadd.f32 %v68_v29, %v65_v30 }
  0xe0   :  { %v72_v37 = vpop.permute.xlu2 %71 }
  0xe1   :  { %v73_v39 = vsel %vm304_vm9, 0.0, %v72_v37 }
  0xe2   :  { %v75_v41 = vmul.f32 %v74_v34, %v73_v39 }
  0xe4   :  { %v76_v45 = vadd.f32 %v75_v41, %v69_v33 }
  0xe6   :  { %v83_v47 = vadd.f32 %v82_v42, %v76_v45 }
  0xe8   :  { %v87_v50 = vadd.f32 %v86_v46, %v83_v47  ;;  %v103_v51 = vpop.permute.xlu2 %102 }
  0xe9   :  { %v104_v53 = vsel %vm295_vm8, 0.0, %v103_v51 }
  0xea   :  { %v94_v54 = vadd.f32 %v93_v48, %v87_v50  ;;  %v106_v55 = vmul.f32 %v105_v49, %v104_v53 }
  0xec   :  { %v107_v57 = vadd.f32 %v106_v55, %v94_v54 }
  0xee   :  { %v111_v58 = vadd.f32 %v110_v56, %v107_v57 }
  0xf0   :  { %v128_v59 = vpop.permute.xlu1 %127  ;;  %v139_v61 = vpop.permute.xlu2 %138 }
  0xf1   :  { %v129_v2 = vsel %vm295_vm8, 0.0, %v128_v59  ;;  %v140_v8 = vsel %vm304_vm9, 0.0, %v139_v61 }
  0xf2   :  { %v131_v6 = vmul.f32 %v130_v0, %v129_v2  ;;  %v142_v15 = vmul.f32 %v141_v7, %v140_v8 }
  0xf8   :  { %v114_v62 = vpop.permute.xlu0 %113  ;;  %v169_v23 = vpop.permute.xlu2 %168 }
  0xf9   :  { %v115_v63 = vsel %vm304_vm9, 0.0, %v114_v62  ;;  %v157_v11 = vpop.permute.xlu1 %156  ;;  %v170_v29 = vsel %vm295_vm8, 0.0, %v169_v23 }
  0xfa   :  { %v117_v3 = vmul.f32 %v116_v60, %v115_v63  ;;  %v158_v21 = vsel %vm304_vm9, 0.0, %v157_v11  ;;  %v172_v33 = vmul.f32 %v171_v28, %v170_v29 }
  0xfb   :  { %v160_v27 = vmul.f32 %v159_v19, %v158_v21 }
  0xfc   :  { %v118_v5 = vadd.f32 %v117_v3, %v111_v58 }
  0xfe   :  { %v132_v10 = vadd.f32 %v131_v6, %v118_v5 }
 0x100   :  { %v136_v16 = vadd.f32 %v135_v9, %v132_v10  ;;  %v146_v17 = vpop.permute.xlu0 %145 }
 0x101   :  { %v147_v18 = vsel %vm295_vm8, 0.0, %v146_v17 }
 0x102   :  { %v143_v24 = vadd.f32 %v142_v15, %v136_v16  ;;  %v149_v25 = vmul.f32 %v148_v13, %v147_v18 }
 0x104   :  { %v150_v26 = vadd.f32 %v149_v25, %v143_v24 }
 0x106   :  { %v154_v30 = vadd.f32 %v153_v12, %v150_v26 }
 0x108   :  { %v161_v34 = vadd.f32 %v160_v27, %v154_v30  ;;  %v180_v35 = vpop.permute.xlu0 %179 }
 0x109   :  { %v181_v37 = vsel %vm304_vm9, 0.0, %v180_v35 }
 0x10a   :  { %v173_v39 = vadd.f32 %v172_v33, %v161_v34  ;;  %v183_v1 = vmul.f32 %v182_v36, %v181_v37 }
 0x10c   :  { %v177_v40 = vadd.f32 %v176_v38, %v173_v39 }
 0x10e   :  { %v184_v41 = vadd.f32 %v183_v1, %v177_v40 }
 0x110   :  { %v185_v42 = vmax.f32 %v184_v41, 0.0 }
 0x112   :  { %186 = vst [vmem:[%s343_s3] sm:$0xff] %v185_v42 }
 0x113   :  { %191 = vsyncpa [#allocation3], 1 }

</bundles_post_ra>
